<compile_context>
chip_gen: v5e
topology: v5e:2x2
jax: 0.10.0
libtpu: 0.0.40
codegen_flags: <defaults>
</compile_context>

<pallas_src>
import jax
import jax.numpy as jnp
from jax.experimental import pallas as pl
from jax.experimental.pallas import tpu as pltpu


def attention_pooling_kernel(x_ref, w1_ref, b1_ref, w2_ref, fused_ref, weights_ref):
    Bt, T, D = x_ref.shape
    H = w1_ref.shape[1]

    # Native-dtype slab (bf16-streamable; no full-slab f32 cast).
    x = x_ref[...]                                                   # (Bt, T, D)

    # ---- attn layer 1: single MXU matmul over all rows of the block ----
    x2d = x.reshape(Bt * T, D)                                       # leading-dim merge
    h = jnp.tanh(
        jnp.dot(x2d, w1_ref[...], preferred_element_type=jnp.float32)
        + b1_ref[...].astype(jnp.float32)                            # (1, H) broadcast
    )                                                                # (Bt*T, H) f32

    # ---- attn layer 2: VPU multiply + lane reduce (instead of N=1 matmul) ----
    # b2 omitted on purpose: softmax(s + c) == softmax(s).
    h3 = h.reshape(Bt, T, H)
    w2_row = w2_ref[...].astype(jnp.float32).reshape(1, 1, H)
    scores = jnp.sum(h3 * w2_row, axis=-1)                           # (Bt, T), T on lanes

    # ---- softmax over T (lane axis -> single lane-reduce per row) ----
    m = jnp.max(scores, axis=-1, keepdims=True)                      # (Bt, 1)
    e = jnp.exp(scores - m)                                          # (Bt, T)
    s = jnp.sum(e, axis=-1, keepdims=True)                           # (Bt, 1)
    weights = e * pl.reciprocal(s, approx=True)                      # (Bt, T) f32

    # ---- weighted pooling on the MXU: (Bt,1,T) x (Bt,T,D) -> (Bt,1,D) ----
    w3 = weights.astype(x.dtype).reshape(Bt, 1, T)
    fused3 = jnp.einsum("bqt,btd->bqd", w3, x,
                        preferred_element_type=jnp.float32)          # (Bt, 1, D)
    fused = fused3.reshape(Bt, D)

    fused_ref[...] = fused.astype(fused_ref.dtype)
    weights_ref[...] = weights.astype(weights_ref.dtype)             # f32, small store
    # (T < 128 makes this a masked vst.msk store; write volume is tiny, accepted.)


def _tpu_vmem_and_dual_tc():
    """Physical VMEM bytes + whether this chip has 2 TensorCores (v7x)."""
    kind = ""
    try:
        kind = jax.devices()[0].device_kind.lower()
    except Exception:
        pass
    physical = None
    try:
        physical = int(pltpu.get_tpu_info().vmem_capacity_bytes)
    except Exception:
        physical = None
    if physical is None:
        # v5e/v6e: 128 MiB; v7x (and unknown, conservatively): 64 MiB per TC.
        physical = (64 << 20) if ("v7" in kind or not kind) else (128 << 20)
    dual_tc = "v7" in kind
    return physical, dual_tc


def _pick_block_b(B, T, D, H, itemsize, vmem_limit, dual_tc):
    """Largest divisor of B whose working set fits the VMEM budget."""
    per_row_x = T * D * itemsize                    # streamed x rows (double-buffered)
    per_row_work = T * H * 4 + (D + 2 * T) * 4      # f32 intermediates + outputs
    fixed = (D * H + 2 * H) * 4 * 2 + (4 << 20)     # params + slack/headroom
    budget = max(0, vmem_limit - fixed)
    cap = max(1, budget // (2 * per_row_x + 2 * per_row_work))
    cap = min(cap, B)

    divisors = [d for d in range(1, B + 1) if B % d == 0]

    def best(limit, aligned_only=False):
        cands = [d for d in divisors if d <= limit and (not aligned_only or d % 8 == 0)]
        return max(cands) if cands else None

    if dual_tc and B >= 2:
        # v7x: guarantee >=2 'parallel' grid steps so both TensorCores pull HBM,
        # but only when the split keeps output sublane blocks (8,·)-aligned.
        d = best(min(cap, B // 2), aligned_only=True)
        if d is not None:
            d256 = max([c for c in divisors
                        if c <= min(cap, B // 2) and c % 8 == 0 and (c * T) % 256 == 0],
                       default=None)
            if d256 is not None and d256 >= d // 2:
                return d256                          # MXU-row aligned, nearly as large
            return d

    # Single-TC (v5e/v6e) or tiny batch: biggest block that fits (grid=(1,) if possible).
    d = best(cap)
    d256 = max([c for c in divisors if c <= cap and (c * T) % 256 == 0], default=None)
    if d256 is not None and d256 >= d // 2:
        return d256
    return d


def attention_pooling(x, w1, b1, w2, b2=None, *, block_b=None, stream_dtype=None):
    """x: (B, T, D); returns (fused (B, D), attn_weights (B, T) in float32).

    b2 is accepted for API parity with the PyTorch module but is mathematically
    a no-op under softmax, so the kernel does not consume it.
    Pass stream_dtype=jnp.bfloat16 to halve HBM traffic for x (HBM-bound kernel);
    accumulation stays f32 either way.
    """
    del b2
    if stream_dtype is not None:
        x = x.astype(stream_dtype)
    B, T, D = x.shape
    H = w1.shape[1]
    w2_row = w2.reshape(1, H)            # (H, 1) -> (1, H) row for the VPU reduce

    physical_vmem, dual_tc = _tpu_vmem_and_dual_tc()
    # Explicit scoped-VMEM limit (v5e default is only 16 MiB of 128 MiB physical;
    # v7x has 64 MiB physical -> keep headroom for the compiler).
    vmem_limit = min(100 << 20, (physical_vmem * 3) // 4)

    if block_b is None:
        block_b = _pick_block_b(B, T, D, H, x.dtype.itemsize, vmem_limit, dual_tc)
    assert B % block_b == 0
    grid = (B // block_b,)

    cost = pl.CostEstimate(
        flops=2 * B * T * D * H + 2 * B * T * H + 2 * B * T * D,
        transcendentals=B * T * (H + 1),
        bytes_accessed=(x.size * x.dtype.itemsize
                        + (w1.size + b1.size + w2.size) * 4
                        + B * D * x.dtype.itemsize
                        + B * T * 4),
    )

    def build(single_buffer_consts):
        def const_spec(shape):
            zero_map = lambda i: (0,) * len(shape)
            if single_buffer_consts:
                # Constant index map: one buffer is enough; frees VMEM for x.
                return pl.BlockSpec(shape, zero_map, pipeline_mode=pl.Buffered(1))
            return pl.BlockSpec(shape, zero_map)

        return pl.pallas_call(
            attention_pooling_kernel,
            out_shape=(
                jax.ShapeDtypeStruct((B, D), x.dtype),
                jax.ShapeDtypeStruct((B, T), jnp.float32),   # fp32 attention weights
            ),
            grid_spec=pltpu.PrefetchScalarGridSpec(
                num_scalar_prefetch=0,
                grid=grid,
                in_specs=[
                    pl.BlockSpec((block_b, T, D), lambda i: (i, 0, 0)),   # x rows
                    const_spec((D, H)),                                   # w1
                    const_spec((1, H)),                                   # b1
                    const_spec((1, H)),                                   # w2 (row)
                ],
                out_specs=[
                    pl.BlockSpec((block_b, D), lambda i: (i, 0)),         # fused
                    pl.BlockSpec((block_b, T), lambda i: (i, 0)),         # attn_weights
                ],
            ),
            compiler_params=pltpu.CompilerParams(
                dimension_semantics=("parallel",),
                vmem_limit_bytes=int(vmem_limit),
            ),
            cost_estimate=cost,
        )

    try:
        fused, weights = build(True)(x, w1, b1, w2_row)
    except Exception:
        # pipeline_mode=pl.Buffered(1) unsupported on this jax build: fall back
        # to default double-buffered constant operands (identical semantics).
        fused, weights = build(False)(x, w1, b1, w2_row)
    return fused, weights


def reference(x, w1, b1, w2, b2):
    h = jnp.tanh(x @ w1 + b1)                      # (B, T, H)
    scores = (h @ w2).squeeze(-1) + b2[0, 0]       # (B, T)
    weights = jax.nn.softmax(scores, axis=1)       # (B, T)
    fused = jnp.einsum("bt,btd->bd", weights, x)   # (B, D)
    return fused, weights


if __name__ == "__main__":
    # Small shapes consistent with the module: batch=2, seq=8, input_dim=32, hidden=16.
    B, T, D, H = 2, 8, 32, 16

    key = jax.random.PRNGKey(0)
    kx, k1, k2, k3, k4 = jax.random.split(key, 5)

    x = jax.random.normal(kx, (B, T, D), dtype=jnp.float32)

    # Deterministic "nn.Linear"-style params (uniform in +/- 1/sqrt(fan_in)).
    lim1 = 1.0 / (D ** 0.5)
    lim2 = 1.0 / (H ** 0.5)
    w1 = jax.random.uniform(k1, (D, H), minval=-lim1, maxval=lim1, dtype=jnp.float32)
    b1 = jax.random.uniform(k2, (1, H), minval=-lim1, maxval=lim1, dtype=jnp.float32)
    w2 = jax.random.uniform(k3, (H, 1), minval=-lim2, maxval=lim2, dtype=jnp.float32)
    b2 = jax.random.uniform(k4, (1, 1), minval=-lim2, maxval=lim2, dtype=jnp.float32)

    fused, weights = attention_pooling(x, w1, b1, w2, b2)
    jax.block_until_ready((fused, weights))

    ref_fused, ref_weights = reference(x, w1, b1, w2, b2)
    # Tolerance covers the EUP approximate reciprocal used in softmax
    # normalization (pl.reciprocal(..., approx=True), ~1e-4 relative error).
    assert jnp.allclose(fused, ref_fused, atol=2e-3, rtol=2e-3)
    assert jnp.allclose(weights, ref_weights, atol=2e-3, rtol=2e-3)

    print("KERNEL_OK")
</pallas_src>

<mosaic_0001>
module attributes {stable_mosaic.version = 11 : i64} {
  func.func @attention_pooling_kernel(%arg0: i32, %arg1: memref<2x8x32xf32, #tpu.memory_space<vmem>>, %arg2: memref<32x16xf32, #tpu.memory_space<vmem>>, %arg3: memref<1x16xf32, #tpu.memory_space<vmem>>, %arg4: memref<1x16xf32, #tpu.memory_space<vmem>>, %arg5: memref<2x32xf32, #tpu.memory_space<vmem>>, %arg6: memref<2x8xf32, #tpu.memory_space<vmem>>) attributes {dimension_semantics = [#tpu.dimension_semantics<parallel>], iteration_bounds = array<i64: 1>, scalar_prefetch = 0 : i64, scratch_operands = 0 : i64, tpu.core_type = #tpu.core_type<tc>, window_params = [{transform_indices = @transform_0, window_bounds = array<i64: 2, 8, 32>}, {pipeline_mode = #tpu.pipeline_mode<synchronous>, transform_indices = @transform_1, window_bounds = array<i64: 32, 16>}, {pipeline_mode = #tpu.pipeline_mode<synchronous>, transform_indices = @transform_2, window_bounds = array<i64: 1, 16>}, {pipeline_mode = #tpu.pipeline_mode<synchronous>, transform_indices = @transform_3, window_bounds = array<i64: 1, 16>}, {transform_indices = @transform_4, window_bounds = array<i64: 2, 32>}, {transform_indices = @transform_5, window_bounds = array<i64: 2, 8>}]} {
    %c0 = arith.constant 0 : index
    %c0_0 = arith.constant 0 : index
    %c0_1 = arith.constant 0 : index
    %0 = vector.load %arg1[%c0, %c0_0, %c0_1] : memref<2x8x32xf32, #tpu.memory_space<vmem>>, vector<2x8x32xf32>
    %1 = vector.shape_cast %0 : vector<2x8x32xf32> to vector<16x32xf32>
    %c0_2 = arith.constant 0 : index
    %c0_3 = arith.constant 0 : index
    %2 = vector.load %arg2[%c0_2, %c0_3] : memref<32x16xf32, #tpu.memory_space<vmem>>, vector<32x16xf32>
    %cst = arith.constant dense<0.000000e+00> : vector<16x16xf32>
    %3 = tpu.matmul %1, %2, %cst {dimension_numbers = #tpu.dot_dimension_numbers<[1], [0], [0], [1], [0, 0, 1, 1], [], []>} : vector<16x32xf32>, vector<32x16xf32>, vector<16x16xf32> -> vector<16x16xf32>
    %c0_4 = arith.constant 0 : index
    %c0_5 = arith.constant 0 : index
    %4 = vector.load %arg3[%c0_4, %c0_5] : memref<1x16xf32, #tpu.memory_space<vmem>>, vector<1x16xf32>
    %5 = vector.broadcast %4 : vector<1x16xf32> to vector<16x16xf32>
    %6 = arith.addf %3, %5 : vector<16x16xf32>
    %7 = math.tanh %6 : vector<16x16xf32>
    %8 = vector.shape_cast %7 : vector<16x16xf32> to vector<2x8x16xf32>
    %c0_6 = arith.constant 0 : index
    %c0_7 = arith.constant 0 : index
    %9 = vector.load %arg4[%c0_6, %c0_7] : memref<1x16xf32, #tpu.memory_space<vmem>>, vector<1x16xf32>
    %10 = vector.shape_cast %9 : vector<1x16xf32> to vector<1x1x16xf32>
    %11 = vector.broadcast %10 : vector<1x1x16xf32> to vector<2x8x16xf32>
    %12 = arith.mulf %8, %11 : vector<2x8x16xf32>
    %cst_8 = arith.constant dense<0.000000e+00> : vector<2x8xf32>
    %13 = vector.multi_reduction <add>, %12, %cst_8 [2] : vector<2x8x16xf32> to vector<2x8xf32>
    %cst_9 = arith.constant dense<0xFF800000> : vector<2xf32>
    %14 = vector.multi_reduction <maximumf>, %13, %cst_9 [1] : vector<2x8xf32> to vector<2xf32>
    %15 = vector.shape_cast %14 : vector<2xf32> to vector<2x1xf32>
    %16 = vector.broadcast %15 : vector<2x1xf32> to vector<2x8xf32>
    %17 = arith.subf %13, %16 : vector<2x8xf32>
    %18 = math.exp %17 : vector<2x8xf32>
    %cst_10 = arith.constant dense<0.000000e+00> : vector<2xf32>
    %19 = vector.multi_reduction <add>, %18, %cst_10 [1] : vector<2x8xf32> to vector<2xf32>
    %20 = vector.shape_cast %19 : vector<2xf32> to vector<2x1xf32>
    %21 = tpu.reciprocal %20 {approx = true} : vector<2x1xf32> -> vector<2x1xf32>
    %22 = vector.broadcast %21 : vector<2x1xf32> to vector<2x8xf32>
    %23 = arith.mulf %18, %22 : vector<2x8xf32>
    %24 = vector.shape_cast %23 : vector<2x8xf32> to vector<2x1x8xf32>
    "tpu.trace_start"() <{level = 10 : i32, message = "bqt,btd->bqd"}> : () -> ()
    %cst_11 = arith.constant dense<0.000000e+00> : vector<2x1x32xf32>
    %25 = tpu.matmul %24, %0, %cst_11 {dimension_numbers = #tpu.dot_dimension_numbers<[2], [1], [1], [2], [0, 0, 0, 1, 1, 2], [0], [0]>} : vector<2x1x8xf32>, vector<2x8x32xf32>, vector<2x1x32xf32> -> vector<2x1x32xf32>
    "tpu.trace_stop"() : () -> ()
    %26 = vector.shape_cast %25 : vector<2x1x32xf32> to vector<2x32xf32>
    %c0_12 = arith.constant 0 : index
    %c0_13 = arith.constant 0 : index
    %27 = vector.load %arg5[%c0_12, %c0_13] : memref<2x32xf32, #tpu.memory_space<vmem>>, vector<2x32xf32>
    tpu.vector_store %arg5[%c0_12, %c0_13], %26 {strides = array<i32>} : memref<2x32xf32, #tpu.memory_space<vmem>>, vector<2x32xf32>,
    %c0_14 = arith.constant 0 : index
    %c0_15 = arith.constant 0 : index
    %28 = vector.load %arg6[%c0_14, %c0_15] : memref<2x8xf32, #tpu.memory_space<vmem>>, vector<2x8xf32>
    tpu.vector_store %arg6[%c0_14, %c0_15], %23 {strides = array<i32>} : memref<2x8xf32, #tpu.memory_space<vmem>>, vector<2x8xf32>,
    return
  }
  func.func @transform_0(%arg0: i32) -> (i32, i32, i32) {
    %c0_i32 = arith.constant 0 : i32
    %c0_i32_0 = arith.constant 0 : i32
    %c0_i32_1 = arith.constant 0 : i32
    return %arg0, %c0_i32, %c0_i32_0 : i32, i32, i32
  }
  func.func @transform_1(%arg0: i32) -> (i32, i32) {
    %c0_i32 = arith.constant 0 : i32
    %c0_i32_0 = arith.constant 0 : i32
    %c0_i32_1 = arith.constant 0 : i32
    return %c0_i32, %c0_i32_0 : i32, i32
  }
  func.func @transform_2(%arg0: i32) -> (i32, i32) {
    %c0_i32 = arith.constant 0 : i32
    %c0_i32_0 = arith.constant 0 : i32
    %c0_i32_1 = arith.constant 0 : i32
    return %c0_i32, %c0_i32_0 : i32, i32
  }
  func.func @transform_3(%arg0: i32) -> (i32, i32) {
    %c0_i32 = arith.constant 0 : i32
    %c0_i32_0 = arith.constant 0 : i32
    %c0_i32_1 = arith.constant 0 : i32
    return %c0_i32, %c0_i32_0 : i32, i32
  }
  func.func @transform_4(%arg0: i32) -> (i32, i32) {
    %c0_i32 = arith.constant 0 : i32
    %c0_i32_0 = arith.constant 0 : i32
    return %arg0, %c0_i32 : i32, i32
  }
  func.func @transform_5(%arg0: i32) -> (i32, i32) {
    %c0_i32 = arith.constant 0 : i32
    %c0_i32_0 = arith.constant 0 : i32
    return %arg0, %c0_i32 : i32, i32
  }
}

module attributes {stable_mosaic.version = 11 : i64} {
  func.func @attention_pooling_kernel(%arg0: i32, %arg1: memref<2x8x32xf32, #tpu.memory_space<vmem>>, %arg2: memref<32x16xf32, #tpu.memory_space<vmem>>, %arg3: memref<1x16xf32, #tpu.memory_space<vmem>>, %arg4: memref<1x16xf32, #tpu.memory_space<vmem>>, %arg5: memref<2x32xf32, #tpu.memory_space<vmem>>, %arg6: memref<2x8xf32, #tpu.memory_space<vmem>>) attributes {dimension_semantics = [#tpu.dimension_semantics<parallel>], iteration_bounds = array<i64: 1>, scalar_prefetch = 0 : i64, scratch_operands = 0 : i64, tpu.core_type = #tpu.core_type<tc>, window_params = [{transform_indices = @transform_0, window_bounds = array<i64: 2, 8, 32>}, {pipeline_mode = #tpu.pipeline_mode<synchronous>, transform_indices = @transform_1, window_bounds = array<i64: 32, 16>}, {pipeline_mode = #tpu.pipeline_mode<synchronous>, transform_indices = @transform_2, window_bounds = array<i64: 1, 16>}, {pipeline_mode = #tpu.pipeline_mode<synchronous>, transform_indices = @transform_3, window_bounds = array<i64: 1, 16>}, {transform_indices = @transform_4, window_bounds = array<i64: 2, 32>}, {transform_indices = @transform_5, window_bounds = array<i64: 2, 8>}]} {
    %c0 = arith.constant 0 : index
    %c0_0 = arith.constant 0 : index
    %c0_1 = arith.constant 0 : index
    %0 = vector.load %arg1[%c0, %c0_0, %c0_1] : memref<2x8x32xf32, #tpu.memory_space<vmem>>, vector<2x8x32xf32>
    %1 = vector.shape_cast %0 : vector<2x8x32xf32> to vector<16x32xf32>
    %c0_2 = arith.constant 0 : index
    %c0_3 = arith.constant 0 : index
    %2 = vector.load %arg2[%c0_2, %c0_3] : memref<32x16xf32, #tpu.memory_space<vmem>>, vector<32x16xf32>
    %cst = arith.constant dense<0.000000e+00> : vector<16x16xf32>
    %3 = tpu.matmul %1, %2, %cst {dimension_numbers = #tpu.dot_dimension_numbers<[1], [0], [0], [1], [0, 0, 1, 1], [], []>} : vector<16x32xf32>, vector<32x16xf32>, vector<16x16xf32> -> vector<16x16xf32>
    %c0_4 = arith.constant 0 : index
    %c0_5 = arith.constant 0 : index
    %4 = vector.load %arg3[%c0_4, %c0_5] : memref<1x16xf32, #tpu.memory_space<vmem>>, vector<1x16xf32>
    %5 = vector.broadcast %4 : vector<1x16xf32> to vector<16x16xf32>
    %6 = arith.addf %3, %5 : vector<16x16xf32>
    %7 = math.tanh %6 : vector<16x16xf32>
    %8 = vector.shape_cast %7 : vector<16x16xf32> to vector<2x8x16xf32>
    %c0_6 = arith.constant 0 : index
    %c0_7 = arith.constant 0 : index
    %9 = vector.load %arg4[%c0_6, %c0_7] : memref<1x16xf32, #tpu.memory_space<vmem>>, vector<1x16xf32>
    %10 = vector.shape_cast %9 : vector<1x16xf32> to vector<1x1x16xf32>
    %11 = vector.broadcast %10 : vector<1x1x16xf32> to vector<2x8x16xf32>
    %12 = arith.mulf %8, %11 : vector<2x8x16xf32>
    %cst_8 = arith.constant dense<0.000000e+00> : vector<2x8xf32>
    %13 = vector.multi_reduction <add>, %12, %cst_8 [2] : vector<2x8x16xf32> to vector<2x8xf32>
    %cst_9 = arith.constant dense<0xFF800000> : vector<2xf32>
    %14 = vector.multi_reduction <maximumf>, %13, %cst_9 [1] : vector<2x8xf32> to vector<2xf32>
    %15 = vector.shape_cast %14 : vector<2xf32> to vector<2x1xf32>
    %16 = vector.broadcast %15 : vector<2x1xf32> to vector<2x8xf32>
    %17 = arith.subf %13, %16 : vector<2x8xf32>
    %18 = math.exp %17 : vector<2x8xf32>
    %cst_10 = arith.constant dense<0.000000e+00> : vector<2xf32>
    %19 = vector.multi_reduction <add>, %18, %cst_10 [1] : vector<2x8xf32> to vector<2xf32>
    %20 = vector.shape_cast %19 : vector<2xf32> to vector<2x1xf32>
    %21 = tpu.reciprocal %20 {approx = true} : vector<2x1xf32> -> vector<2x1xf32>
    %22 = vector.broadcast %21 : vector<2x1xf32> to vector<2x8xf32>
    %23 = arith.mulf %18, %22 : vector<2x8xf32>
    %24 = vector.shape_cast %23 : vector<2x8xf32> to vector<2x1x8xf32>
    "tpu.trace_start"() <{level = 10 : i32, message = "bqt,btd->bqd"}> : () -> ()
    %cst_11 = arith.constant dense<0.000000e+00> : vector<2x1x32xf32>
    %25 = tpu.matmul %24, %0, %cst_11 {dimension_numbers = #tpu.dot_dimension_numbers<[2], [1], [1], [2], [0, 0, 0, 1, 1, 2], [0], [0]>} : vector<2x1x8xf32>, vector<2x8x32xf32>, vector<2x1x32xf32> -> vector<2x1x32xf32>
    "tpu.trace_stop"() : () -> ()
    %26 = vector.shape_cast %25 : vector<2x1x32xf32> to vector<2x32xf32>
    %c0_12 = arith.constant 0 : index
    %c0_13 = arith.constant 0 : index
    %27 = vector.load %arg5[%c0_12, %c0_13] : memref<2x32xf32, #tpu.memory_space<vmem>>, vector<2x32xf32>
    tpu.vector_store %arg5[%c0_12, %c0_13], %26 {strides = array<i32>} : memref<2x32xf32, #tpu.memory_space<vmem>>, vector<2x32xf32>,
    %c0_14 = arith.constant 0 : index
    %c0_15 = arith.constant 0 : index
    %28 = vector.load %arg6[%c0_14, %c0_15] : memref<2x8xf32, #tpu.memory_space<vmem>>, vector<2x8xf32>
    tpu.vector_store %arg6[%c0_14, %c0_15], %23 {strides = array<i32>} : memref<2x8xf32, #tpu.memory_space<vmem>>, vector<2x8xf32>,
    return
  }
  func.func @transform_0(%arg0: i32) -> (i32, i32, i32) {
    %c0_i32 = arith.constant 0 : i32
    %c0_i32_0 = arith.constant 0 : i32
    %c0_i32_1 = arith.constant 0 : i32
    return %arg0, %c0_i32, %c0_i32_0 : i32, i32, i32
  }
  func.func @transform_1(%arg0: i32) -> (i32, i32) {
    %c0_i32 = arith.constant 0 : i32
    %c0_i32_0 = arith.constant 0 : i32
    %c0_i32_1 = arith.constant 0 : i32
    return %c0_i32, %c0_i32_0 : i32, i32
  }
  func.func @transform_2(%arg0: i32) -> (i32, i32) {
    %c0_i32 = arith.constant 0 : i32
    %c0_i32_0 = arith.constant 0 : i32
    %c0_i32_1 = arith.constant 0 : i32
    return %c0_i32, %c0_i32_0 : i32, i32
  }
  func.func @transform_3(%arg0: i32) -> (i32, i32) {
    %c0_i32 = arith.constant 0 : i32
    %c0_i32_0 = arith.constant 0 : i32
    %c0_i32_1 = arith.constant 0 : i32
    return %c0_i32, %c0_i32_0 : i32, i32
  }
  func.func @transform_4(%arg0: i32) -> (i32, i32) {
    %c0_i32 = arith.constant 0 : i32
    %c0_i32_0 = arith.constant 0 : i32
    return %arg0, %c0_i32 : i32, i32
  }
  func.func @transform_5(%arg0: i32) -> (i32, i32) {
    %c0_i32 = arith.constant 0 : i32
    %c0_i32_0 = arith.constant 0 : i32
    return %arg0, %c0_i32 : i32, i32
  }
}

</mosaic_0001>

<bundles_post_ra>
// kernel: tpu_custom_call.1
= control target key start
LH: loop header
LB: loop body
LE: loop exit
PB: predicated region body
PF: predicated region fallthrough
CT: control target
= control target key end

     0   :  { %11 = vsyncpa [#allocation3], 0  ;;  %s368_s0 = inlined_call_operand.vmem [shape: f32[2,8,32], index: 0, kind: input, shape index: {}]   ;;  %s369_s1 = inlined_call_operand.vmem [shape: f32[32,16], index: 1, kind: input, shape index: {}]   ;;  %s370_s2 = inlined_call_operand.vmem [shape: f32[1,16], index: 2, kind: input, shape index: {}]   ;;  %s371_s3 = inlined_call_operand.vmem [shape: f32[1,16], index: 3, kind: input, shape index: {}]   ;;  %s372_s4 = inlined_call_operand.hbm [shape: f32[2,32], index: 4, kind: output, shape index: {0}]   ;;  %s373_s5 = inlined_call_operand.hbm [shape: f32[2,8], index: 5, kind: output, shape index: {1}]  }
   0x1   :  { %v26_v0 = vld [vmem:[%s369_s1 + $0x18] sm:$0xff]  ;;  %v25_v1 = vld [vmem:[%s369_s1 + $0x10] sm:$0xff]  ;;  %v21_v2 = vld [vmem:[%s368_s0] sm:$0xff] }
   0x2   :  { %50 = vmatpush.msra.mxu0 %v26_v0  ;;  %224 = vmatpush.msra.mxu3 %v26_v0  ;;  %v22_v3 = vld [vmem:[%s368_s0 + $0x8] sm:$0xff] }
   0x3   :  { %v24_v4 = vld [vmem:[%s369_s1 + $0x8] sm:$0xff]  ;;  %146 = vmatpush.msra.mxu1 %v21_v2  ;;  %173 = vmatpush.msra.mxu2 %v22_v3 }
   0x4   :  { %51 = vmatpush.msra.mxu0 %v25_v1  ;;  %225 = vmatpush.msra.mxu3 %v25_v1 }
   0x5   :  { %12 = vsyncpa [#allocation5], 0  ;;  %v23_v5 = vld [vmem:[%s369_s1] sm:$0xff]  ;;  %vm31_vm0 = vcmask 261120   ;;  %vm69_vm1 = vcmask 130048   ;;  %v78_v19 = vlaneseq  ;;  %vm82_vm2 = vcmask 1041409  }
   0x6   :  { %52 = vmatpush.msra.mxu0 %v24_v4  ;;  %226 = vmatpush.msra.mxu3 %v24_v4  ;;  %v234_v6 = vld [vmem:[%s370_s2] ss:$0 sm:$0xff]  ;;  %vm85_vm3 = vcmask 58368   ;;  %v298_v26 = vmov 0   ;;  %vm128_vm4 = vcmask 64512   ;;  %s299_s1 = smov [#allocation4]  }
   0x7   :  { %v235_v10 = vld [vmem:[%s371_s3] ss:$0 sm:$0xff]  ;;  %v79_v20 = vand.u32 127, %v78_v19  ;;  %232 = vset.pattern.permute.xlu2 %v298_v26  ;;  %231 = vset.pattern.permute.xlu1 %v298_v26  ;;  %s204_s2 = sshll.u32 %s299_s1, 4  ;;  %s206_s9 = sshll.u32 %s373_s5, 4  ;;  %vm183_vm5 = vcmask 254976   ;;  %s205_s2 = int_to_ptr.vmem [resolvable:$true] %s204_s2  ;;  %s207_s9 = int_to_ptr.hbm [resolvable:$true] %s206_s9 }
   0x8   :  { %53 = vmatpush.msra.mxu0 %v23_v5  ;;  %227 = vmatpush.msra.mxu3 %v23_v5  ;;  %s300_s10 = smov [#allocation2]   ;;  %s195_s14 = sshll.u32 %s372_s4, 4  ;;  %s196_s14 = int_to_ptr.hbm [resolvable:$true] %s195_s14 }
   0x9   :  { %220 = vmatmul.msk.f32.vlgmr.msra.gmra.mxu0 %vm31_vm0, %v21_v2  ;;  %221 = vmatmul.msk.f32.vlgmr.msra.gmra.mxu3 %vm31_vm0, %v22_v3  ;;  %s193_s11 = sshll.u32 %s300_s10, 4  ;;  %s194_s11 = int_to_ptr.vmem [resolvable:$true] %s193_s11 }
   0xa   :  { %233 = vset.pattern.permute.xlu0 %v298_v26 }
  0x86   :  { %v55_v7 = vpop.f32.mrf.mxu0 }
  0x87   :  { %v56_v8 = vadd.f32 %v234_v6, %v55_v7 }
  0x89   :  { %236 = vtanh.f32 %v56_v8 }
  0x8c   :  { %v58_v9 = vpop.f32.mrf.mxu3 }
  0x8d   :  { %v59_v11 = vadd.f32 %v234_v6, %v58_v9 }
  0x8f   :  { %v237_v12 = vpop.eup %236  ;;  %238 = vtanh.f32 %v59_v11 }
  0x90   :  { %v67_v13 = vmul.f32 %v237_v12, %v235_v10 }
  0x92   :  { %v70_v14 = vsel %vm69_vm1, %v67_v13, 0.0 }
  0x93   :  { %71 = vadd.xlane.f32.xlu0 %v70_v14 }
  0x95   :  { %v239_v15 = vpop.eup %238 }
  0x96   :  { %v68_v16 = vmul.f32 %v239_v15, %v235_v10 }
  0x98   :  { %v73_v17 = vsel %vm69_vm1, %v68_v16, 0.0 }
  0x9b   :  { %74 = vadd.xlane.f32.xlu0 %v73_v17 }
 0x106   :  { %v72_v18 = vpop.xlane.xlu0 %71 }
 0x107   :  { %v80_v22 = vperm.slane %v72_v18, %v79_v20 }
 0x10e   :  { %v75_v21 = vpop.xlane.xlu0 %74 }
 0x10f   :  { %v81_v23 = vperm.slane %v75_v21, %v79_v20 }
 0x111   :  { %v83_v24 = vsel %vm82_vm2, %v81_v23, %v80_v22 }
 0x112   :  { %v86_v25 = vsel %vm85_vm3, %v83_v24, -inf }
 0x113   :  { %87 = vmax.xlane.f32.xlu1 %v86_v25 }
 0x186   :  { %v88_v27 = vpop.xlane.xlu1 %87 }
 0x187   :  { %v90_v28 = vperm.slane %v88_v27, 0  ;;  %v91_v29 = vperm.slane %v88_v27, 1 }
 0x189   :  { %v94_v30 = vsub.f32 %v72_v18, %v90_v28  ;;  %v95_v31 = vsub.f32 %v75_v21, %v91_v29 }
 0x18b   :  { %v96_v32 = vmul.f32 1.442695, %v94_v30  ;;  %v98_v33 = vmul.f32 1.442695, %v95_v31 }
 0x18d   :  { %240 = vpow2.f32 %v96_v32 }
 0x18e   :  { %242 = vpow2.f32 %v98_v33 }
 0x193   :  { %v241_v34 = vpop.eup %240 }
 0x194   :  { %v243_v35 = vpop.eup %242  ;;  %103 = vperm.xlu1 %231, %v241_v34  }
 0x195   :  { %106 = vperm.xlu2 %232, %v243_v35  }
 0x1ef   :  { %v107_v36 = vpop.permute.xlu2 %106 }
 0x1f0   :  { %v109_v38 = vperm.slane %v107_v36, %v79_v20 }
 0x206   :  { %v104_v37 = vpop.permute.xlu1 %103 }
 0x207   :  { %v108_v39 = vperm.slane %v104_v37, %v79_v20 }
 0x209   :  { %v110_v40 = vsel %vm82_vm2, %v109_v38, %v108_v39 }
 0x20a   :  { %v112_v41 = vsel %vm85_vm3, %v110_v40, 0.0 }
 0x20b   :  { %113 = vadd.xlane.f32.xlu2 %v112_v41 }
 0x27e   :  { %v114_v42 = vpop.xlane.xlu2 %113 }
 0x27f   :  { %244 = vrcp.f32 %v114_v42 }
 0x285   :  { %v245_v43 = vpop.eup %244 }
 0x286   :  { %v118_v44 = vperm.slane %v245_v43, 1  ;;  %v117_v45 = vperm.slane %v245_v43, 0 }
 0x288   :  { %v122_v46 = vmul.f32 %v243_v35, %v118_v44  ;;  %v121_v47 = vmul.f32 %v241_v34, %v117_v45 }
 0x28a   :  { %153 = vperm.xlu0 %233, %v122_v46   ;;  %125 = vperm.xlu1 %231, %v121_v47  }
 0x2fc   :  { %v154_v48 = vpop.permute.xlu0 %153  ;;  %v126_v49 = vpop.permute.xlu1 %125 }
 0x2fd   :  { %v155_v50 = vperm.slane %v154_v48, %v79_v20  ;;  %v127_v51 = vperm.slane %v126_v49, %v79_v20 }
 0x2ff   :  { %222 = vmatmul.msk.f32.vlgmr.msra.gmra.mxu1 %vm128_vm4, %v127_v51  ;;  %223 = vmatmul.msk.f32.vlgmr.msra.gmra.mxu2 %vm128_vm4, %v155_v50  ;;  %v185_v52 = vsel %vm82_vm2, %v155_v50, %v127_v51 }
 0x300   :  { %187 = vst.msk [vmem:[#allocation4] sm:$0x3] %vm85_vm3, %v185_v52 }
 0x301   :  { %209 = dma.vmem_to_hbm [thread:$0]  %s205_s2, 32, %s207_s9, [#allocation5]  }
 0x37c   :  { %v148_v55 = vpop.f32.mrf.mxu1 }
 0x382   :  { %v175_v53 = vpop.f32.mrf.mxu2 }
 0x383   :  { %v180_v54 = vrot.slane %v175_v53, 7 }
 0x385   :  { %v181_v56 = vsel %vm82_vm2, %v180_v54, %v148_v55 }
 0x386   :  { %184 = vst.msk [vmem:[#allocation2] sm:$0x3] %vm183_vm5, %v181_v56 }
 0x387   :  { %198 = dma.vmem_to_hbm [thread:$0]  %s194_s11, 32, %s196_s14, [#allocation3]  }
 0x388   :  { %294 = dma.done.wait [#allocation3], 32  }
 0x389   :  { %295 = vsyncadd [#allocation3], 4294967264 }
 0x38a   :  { %296 = dma.done.wait [#allocation5], 32  }
 0x38b   :  { %297 = vsyncadd [#allocation5], 4294967264 }
 0x38c   :  { %218 = vsyncpa [#allocation3], 1 }
 0x38d   :  { %219 = vsyncpa [#allocation5], 1 }

// kernel: tpu_custom_call.1
= control target key start
LH: loop header
LB: loop body
LE: loop exit
PB: predicated region body
PF: predicated region fallthrough
CT: control target
= control target key end

     0   :  { %11 = vsyncpa [#allocation3], 0  ;;  %s368_s0 = inlined_call_operand.vmem [shape: f32[2,8,32], index: 0, kind: input, shape index: {}]   ;;  %s369_s1 = inlined_call_operand.vmem [shape: f32[32,16], index: 1, kind: input, shape index: {}]   ;;  %s370_s2 = inlined_call_operand.vmem [shape: f32[1,16], index: 2, kind: input, shape index: {}]   ;;  %s371_s3 = inlined_call_operand.vmem [shape: f32[1,16], index: 3, kind: input, shape index: {}]   ;;  %s372_s4 = inlined_call_operand.hbm [shape: f32[2,32], index: 4, kind: output, shape index: {0}]   ;;  %s373_s5 = inlined_call_operand.hbm [shape: f32[2,8], index: 5, kind: output, shape index: {1}]  }
   0x1   :  { %v26_v0 = vld [vmem:[%s369_s1 + $0x18] sm:$0xff]  ;;  %v25_v1 = vld [vmem:[%s369_s1 + $0x10] sm:$0xff]  ;;  %v21_v2 = vld [vmem:[%s368_s0] sm:$0xff] }
   0x2   :  { %50 = vmatpush.msra.mxu0 %v26_v0  ;;  %224 = vmatpush.msra.mxu3 %v26_v0  ;;  %v22_v3 = vld [vmem:[%s368_s0 + $0x8] sm:$0xff] }
   0x3   :  { %v24_v4 = vld [vmem:[%s369_s1 + $0x8] sm:$0xff]  ;;  %146 = vmatpush.msra.mxu1 %v21_v2  ;;  %173 = vmatpush.msra.mxu2 %v22_v3 }
   0x4   :  { %51 = vmatpush.msra.mxu0 %v25_v1  ;;  %225 = vmatpush.msra.mxu3 %v25_v1 }
   0x5   :  { %12 = vsyncpa [#allocation5], 0  ;;  %v23_v5 = vld [vmem:[%s369_s1] sm:$0xff]  ;;  %vm31_vm0 = vcmask 261120   ;;  %vm69_vm1 = vcmask 130048   ;;  %v78_v19 = vlaneseq  ;;  %vm82_vm2 = vcmask 1041409  }
   0x6   :  { %52 = vmatpush.msra.mxu0 %v24_v4  ;;  %226 = vmatpush.msra.mxu3 %v24_v4  ;;  %v234_v6 = vld [vmem:[%s370_s2] ss:$0 sm:$0xff]  ;;  %vm85_vm3 = vcmask 58368   ;;  %v298_v26 = vmov 0   ;;  %vm128_vm4 = vcmask 64512   ;;  %s299_s1 = smov [#allocation4]  }
   0x7   :  { %v235_v10 = vld [vmem:[%s371_s3] ss:$0 sm:$0xff]  ;;  %v79_v20 = vand.u32 127, %v78_v19  ;;  %232 = vset.pattern.permute.xlu2 %v298_v26  ;;  %231 = vset.pattern.permute.xlu1 %v298_v26  ;;  %s204_s2 = sshll.u32 %s299_s1, 4  ;;  %s206_s9 = sshll.u32 %s373_s5, 4  ;;  %vm183_vm5 = vcmask 254976   ;;  %s205_s2 = int_to_ptr.vmem [resolvable:$true] %s204_s2  ;;  %s207_s9 = int_to_ptr.hbm [resolvable:$true] %s206_s9 }
   0x8   :  { %53 = vmatpush.msra.mxu0 %v23_v5  ;;  %227 = vmatpush.msra.mxu3 %v23_v5  ;;  %s300_s10 = smov [#allocation2]   ;;  %s195_s14 = sshll.u32 %s372_s4, 4  ;;  %s196_s14 = int_to_ptr.hbm [resolvable:$true] %s195_s14 }
   0x9   :  { %220 = vmatmul.msk.f32.vlgmr.msra.gmra.mxu0 %vm31_vm0, %v21_v2  ;;  %221 = vmatmul.msk.f32.vlgmr.msra.gmra.mxu3 %vm31_vm0, %v22_v3  ;;  %s193_s11 = sshll.u32 %s300_s10, 4  ;;  %s194_s11 = int_to_ptr.vmem [resolvable:$true] %s193_s11 }
   0xa   :  { %233 = vset.pattern.permute.xlu0 %v298_v26 }
  0x86   :  { %v55_v7 = vpop.f32.mrf.mxu0 }
  0x87   :  { %v56_v8 = vadd.f32 %v234_v6, %v55_v7 }
  0x89   :  { %236 = vtanh.f32 %v56_v8 }
  0x8c   :  { %v58_v9 = vpop.f32.mrf.mxu3 }
  0x8d   :  { %v59_v11 = vadd.f32 %v234_v6, %v58_v9 }
  0x8f   :  { %v237_v12 = vpop.eup %236  ;;  %238 = vtanh.f32 %v59_v11 }
  0x90   :  { %v67_v13 = vmul.f32 %v237_v12, %v235_v10 }
  0x92   :  { %v70_v14 = vsel %vm69_vm1, %v67_v13, 0.0 }
  0x93   :  { %71 = vadd.xlane.f32.xlu0 %v70_v14 }
  0x95   :  { %v239_v15 = vpop.eup %238 }
  0x96   :  { %v68_v16 = vmul.f32 %v239_v15, %v235_v10 }
  0x98   :  { %v73_v17 = vsel %vm69_vm1, %v68_v16, 0.0 }
  0x9b   :  { %74 = vadd.xlane.f32.xlu0 %v73_v17 }
 0x106   :  { %v72_v18 = vpop.xlane.xlu0 %71 }
 0x107   :  { %v80_v22 = vperm.slane %v72_v18, %v79_v20 }
 0x10e   :  { %v75_v21 = vpop.xlane.xlu0 %74 }
 0x10f   :  { %v81_v23 = vperm.slane %v75_v21, %v79_v20 }
 0x111   :  { %v83_v24 = vsel %vm82_vm2, %v81_v23, %v80_v22 }
 0x112   :  { %v86_v25 = vsel %vm85_vm3, %v83_v24, -inf }
 0x113   :  { %87 = vmax.xlane.f32.xlu1 %v86_v25 }
 0x186   :  { %v88_v27 = vpop.xlane.xlu1 %87 }
 0x187   :  { %v90_v28 = vperm.slane %v88_v27, 0  ;;  %v91_v29 = vperm.slane %v88_v27, 1 }
 0x189   :  { %v94_v30 = vsub.f32 %v72_v18, %v90_v28  ;;  %v95_v31 = vsub.f32 %v75_v21, %v91_v29 }
 0x18b   :  { %v96_v32 = vmul.f32 1.442695, %v94_v30  ;;  %v98_v33 = vmul.f32 1.442695, %v95_v31 }
 0x18d   :  { %240 = vpow2.f32 %v96_v32 }
 0x18e   :  { %242 = vpow2.f32 %v98_v33 }
 0x193   :  { %v241_v34 = vpop.eup %240 }
 0x194   :  { %v243_v35 = vpop.eup %242  ;;  %103 = vperm.xlu1 %231, %v241_v34  }
 0x195   :  { %106 = vperm.xlu2 %232, %v243_v35  }
 0x1ef   :  { %v107_v36 = vpop.permute.xlu2 %106 }
 0x1f0   :  { %v109_v38 = vperm.slane %v107_v36, %v79_v20 }
 0x206   :  { %v104_v37 = vpop.permute.xlu1 %103 }
 0x207   :  { %v108_v39 = vperm.slane %v104_v37, %v79_v20 }
 0x209   :  { %v110_v40 = vsel %vm82_vm2, %v109_v38, %v108_v39 }
 0x20a   :  { %v112_v41 = vsel %vm85_vm3, %v110_v40, 0.0 }
 0x20b   :  { %113 = vadd.xlane.f32.xlu2 %v112_v41 }
 0x27e   :  { %v114_v42 = vpop.xlane.xlu2 %113 }
 0x27f   :  { %244 = vrcp.f32 %v114_v42 }
 0x285   :  { %v245_v43 = vpop.eup %244 }
 0x286   :  { %v118_v44 = vperm.slane %v245_v43, 1  ;;  %v117_v45 = vperm.slane %v245_v43, 0 }
 0x288   :  { %v122_v46 = vmul.f32 %v243_v35, %v118_v44  ;;  %v121_v47 = vmul.f32 %v241_v34, %v117_v45 }
 0x28a   :  { %153 = vperm.xlu0 %233, %v122_v46   ;;  %125 = vperm.xlu1 %231, %v121_v47  }
 0x2fc   :  { %v154_v48 = vpop.permute.xlu0 %153  ;;  %v126_v49 = vpop.permute.xlu1 %125 }
 0x2fd   :  { %v155_v50 = vperm.slane %v154_v48, %v79_v20  ;;  %v127_v51 = vperm.slane %v126_v49, %v79_v20 }
 0x2ff   :  { %222 = vmatmul.msk.f32.vlgmr.msra.gmra.mxu1 %vm128_vm4, %v127_v51  ;;  %223 = vmatmul.msk.f32.vlgmr.msra.gmra.mxu2 %vm128_vm4, %v155_v50  ;;  %v185_v52 = vsel %vm82_vm2, %v155_v50, %v127_v51 }
 0x300   :  { %187 = vst.msk [vmem:[#allocation4] sm:$0x3] %vm85_vm3, %v185_v52 }
 0x301   :  { %209 = dma.vmem_to_hbm [thread:$0]  %s205_s2, 32, %s207_s9, [#allocation5]  }
 0x37c   :  { %v148_v55 = vpop.f32.mrf.mxu1 }
 0x382   :  { %v175_v53 = vpop.f32.mrf.mxu2 }
 0x383   :  { %v180_v54 = vrot.slane %v175_v53, 7 }
 0x385   :  { %v181_v56 = vsel %vm82_vm2, %v180_v54, %v148_v55 }
 0x386   :  { %184 = vst.msk [vmem:[#allocation2] sm:$0x3] %vm183_vm5, %v181_v56 }
 0x387   :  { %198 = dma.vmem_to_hbm [thread:$0]  %s194_s11, 32, %s196_s14, [#allocation3]  }
 0x388   :  { %294 = dma.done.wait [#allocation3], 32  }
 0x389   :  { %295 = vsyncadd [#allocation3], 4294967264 }
 0x38a   :  { %296 = dma.done.wait [#allocation5], 32  }
 0x38b   :  { %297 = vsyncadd [#allocation5], 4294967264 }
 0x38c   :  { %218 = vsyncpa [#allocation3], 1 }
 0x38d   :  { %219 = vsyncpa [#allocation5], 1 }

</bundles_post_ra>
